<compile_context>
chip_gen: v7x
topology: tpu7x:2x2x1
jax: 0.10.0
libtpu: 0.0.40
codegen_flags: <defaults>
</compile_context>

<pallas_src>
import functools

import jax
import jax.numpy as jnp
from jax.experimental import pallas as pl
from jax.experimental.pallas import tpu as pltpu

IN_DIM = 28 * 28  # 784
DIMS = [IN_DIM, 128, 64, 32, 64, 128, IN_DIM]          # true layer dims
PAD_DIMS = [IN_DIM, 128, 128, 128, 128, 128, IN_DIM]   # hidden 64/32 padded to 128 lanes

_TRUE_MACS_PER_ROW = sum(DIMS[i] * DIMS[i + 1] for i in range(len(DIMS) - 1))  # 221184


def _round_up(x, m):
    return ((x + m - 1) // m) * m


def _ae_kernel(x_ref,
               w1, b1, w2, b2, w3, b3,   # encoder
               w4, b4, w5, b5, w6, b6,   # decoder
               o_ref, *, compute_dtype):
    """Six fused matmuls.  Dot operands in compute_dtype (bf16 by default) with f32
    accumulation; bias add / ReLU / tanh in f32."""
    def layer(h, w, b, act):
        y = jnp.dot(h.astype(compute_dtype), w[...],
                    preferred_element_type=jnp.float32)
        return act(y + b[...])

    relu = lambda v: jnp.maximum(v, 0.0)

    h = x_ref[...]
    h = layer(h, w1, b1, relu)
    h = layer(h, w2, b2, relu)
    h = layer(h, w3, b3, relu)
    h = layer(h, w4, b4, relu)
    h = layer(h, w5, b5, relu)
    h = layer(h, w6, b6, jnp.tanh)
    o_ref[...] = h.astype(o_ref.dtype)


def _prepare_params(params, compute_dtype):
    """Pad hidden dims (64, 32) up to 128 lanes and cast weights to compute_dtype.
    Padding is exact: zero weight cols/rows + zero bias, ReLU(0)=0.  Biases stay f32."""
    prepped = []
    for li, (w_t, b) in enumerate(params):
        in_true, out_true = DIMS[li], DIMS[li + 1]
        in_pad, out_pad = PAD_DIMS[li], PAD_DIMS[li + 1]
        assert w_t.shape == (in_true, out_true)
        w_p = jnp.zeros((in_pad, out_pad), compute_dtype).at[:in_true, :out_true].set(
            w_t.astype(compute_dtype))
        b_p = jnp.zeros((1, out_pad), jnp.float32).at[:, :out_true].set(
            jnp.reshape(b, (1, out_true)).astype(jnp.float32))
        prepped.append((w_p, b_p))
    return prepped


@functools.partial(jax.jit, static_argnames=("batch_tile", "compute_dtype"))
def autoencoder_forward(x, params, *, batch_tile=1024, compute_dtype=jnp.bfloat16):
    """x: (B, 784).  params: list of 6 (W_t, b) with W_t (in, out), b (out,)."""
    B, D = x.shape
    assert D == IN_DIM

    # 8-row-aligned batch tile, capped so the grid keeps >=2 parallel steps when possible
    # (both v7x TensorCores get work); ragged last tile is masked by Pallas.
    bt = min(_round_up(int(batch_tile), 8), _round_up(pl.cdiv(B, 2), 8))
    bt = max(bt, 8)
    grid = (pl.cdiv(B, bt),)

    prepped = _prepare_params(params, compute_dtype)

    flat_params = []
    in_specs = [pl.BlockSpec((bt, IN_DIM), lambda i: (i, 0))]
    weight_bytes = 0
    for (w_p, b_p) in prepped:
        flat_params.append(w_p)
        flat_params.append(b_p)
        in_specs.append(pl.BlockSpec(w_p.shape, lambda i: (0, 0)))
        in_specs.append(pl.BlockSpec(b_p.shape, lambda i: (0, 0)))
        weight_bytes += w_p.size * w_p.dtype.itemsize + b_p.size * b_p.dtype.itemsize

    io_itemsize = x.dtype.itemsize
    cost = pl.CostEstimate(
        flops=2 * B * _TRUE_MACS_PER_ROW,
        transcendentals=B * IN_DIM,                               # final tanh
        bytes_accessed=B * IN_DIM * io_itemsize * 2 + weight_bytes,
    )

    # Actual footprint: double-buffered in/out tiles + resident weights + f32 temporaries.
    io_tile_bytes = bt * IN_DIM * io_itemsize
    vmem_limit = int(4 * io_tile_bytes + 2 * weight_bytes
                     + 3 * bt * IN_DIM * 4 + (8 << 20))
    vmem_limit = max(min(vmem_limit, 64 << 20), 24 << 20)

    out = pl.pallas_call(
        functools.partial(_ae_kernel, compute_dtype=compute_dtype),
        out_shape=jax.ShapeDtypeStruct((B, IN_DIM), x.dtype),
        grid_spec=pltpu.PrefetchScalarGridSpec(
            num_scalar_prefetch=0,
            grid=grid,
            in_specs=in_specs,
            out_specs=pl.BlockSpec((bt, IN_DIM), lambda i: (i, 0)),
        ),
        compiler_params=pltpu.CompilerParams(
            dimension_semantics=("parallel",),
            vmem_limit_bytes=vmem_limit,
        ),
        cost_estimate=cost,
    )(x, *flat_params)
    return out


def init_params(key):
    """PyTorch Linear default init (uniform +/- 1/sqrt(fan_in)).
    Returns list of (W_transposed (in, out), bias (out,))."""
    params = []
    for li in range(len(DIMS) - 1):
        fan_in, fan_out = DIMS[li], DIMS[li + 1]
        key, kw, kb = jax.random.split(key, 3)
        bound = 1.0 / jnp.sqrt(jnp.float32(fan_in))
        w = jax.random.uniform(kw, (fan_out, fan_in), jnp.float32, -bound, bound)
        b = jax.random.uniform(kb, (fan_out,), jnp.float32, -bound, bound)
        params.append((w.T, b))
    return params


def reference_forward(x, params):
    h = x.astype(jnp.float32)
    for idx, (w_t, b) in enumerate(params):
        h = h @ w_t.astype(jnp.float32) + b.astype(jnp.float32).reshape(1, -1)
        h = jnp.maximum(h, 0.0) if idx < len(params) - 1 else jnp.tanh(h)
    return h


if __name__ == "__main__":
    key = jax.random.PRNGKey(0)
    kx, kp = jax.random.split(key)
    params = init_params(kp)

    # --- exact-math path (f32 MXU operands), small batch, single tile ---
    B = 8
    x = jax.random.normal(kx, (B, IN_DIM), jnp.float32)
    out_f32 = jax.block_until_ready(
        autoencoder_forward(x, params, compute_dtype=jnp.float32))
    ref_f32 = reference_forward(x, params)
    assert out_f32.shape == (B, IN_DIM)
    assert jnp.allclose(out_f32, ref_f32, atol=1e-5, rtol=1e-5), \
        "f32 mismatch vs JAX reference"

    # --- default perf path: bf16 MXU operands, 2-step parallel grid with ragged tail ---
    B2 = 1000  # bt becomes 504 -> grid=(2,), second tile ragged (496 valid rows)
    x2 = jax.random.normal(kx, (B2, IN_DIM), jnp.float32)
    out_bf16 = jax.block_until_ready(autoencoder_forward(x2, params))
    ref2 = reference_forward(x2, params)
    assert out_bf16.shape == (B2, IN_DIM)
    # tanh output is bounded in [-1, 1]; bf16 weight/activation rounding dominates the error
    assert jnp.allclose(out_bf16, ref2, atol=4e-2, rtol=0.0), \
        "bf16 mismatch vs JAX reference"

    print("KERNEL_OK")
</pallas_src>

<mosaic_0001>
module attributes {stable_mosaic.version = 11 : i64} {
  func.func @_ae_kernel(%arg0: i32, %arg1: memref<8x784xf32, #tpu.memory_space<vmem>>, %arg2: memref<784x128xf32, #tpu.memory_space<vmem>>, %arg3: memref<1x128xf32, #tpu.memory_space<vmem>>, %arg4: memref<128x128xf32, #tpu.memory_space<vmem>>, %arg5: memref<1x128xf32, #tpu.memory_space<vmem>>, %arg6: memref<128x128xf32, #tpu.memory_space<vmem>>, %arg7: memref<1x128xf32, #tpu.memory_space<vmem>>, %arg8: memref<128x128xf32, #tpu.memory_space<vmem>>, %arg9: memref<1x128xf32, #tpu.memory_space<vmem>>, %arg10: memref<128x128xf32, #tpu.memory_space<vmem>>, %arg11: memref<1x128xf32, #tpu.memory_space<vmem>>, %arg12: memref<128x784xf32, #tpu.memory_space<vmem>>, %arg13: memref<1x784xf32, #tpu.memory_space<vmem>>, %arg14: memref<8x784xf32, #tpu.memory_space<vmem>>) attributes {dimension_semantics = [#tpu.dimension_semantics<parallel>], iteration_bounds = array<i64: 1>, scalar_prefetch = 0 : i64, scratch_operands = 0 : i64, tpu.core_type = #tpu.core_type<tc>, window_params = [{transform_indices = @transform_0, window_bounds = array<i64: 8, 784>}, {pipeline_mode = #tpu.pipeline_mode<synchronous>, transform_indices = @transform_1, window_bounds = array<i64: 784, 128>}, {pipeline_mode = #tpu.pipeline_mode<synchronous>, transform_indices = @transform_2, window_bounds = array<i64: 1, 128>}, {pipeline_mode = #tpu.pipeline_mode<synchronous>, transform_indices = @transform_3, window_bounds = array<i64: 128, 128>}, {pipeline_mode = #tpu.pipeline_mode<synchronous>, transform_indices = @transform_4, window_bounds = array<i64: 1, 128>}, {pipeline_mode = #tpu.pipeline_mode<synchronous>, transform_indices = @transform_5, window_bounds = array<i64: 128, 128>}, {pipeline_mode = #tpu.pipeline_mode<synchronous>, transform_indices = @transform_6, window_bounds = array<i64: 1, 128>}, {pipeline_mode = #tpu.pipeline_mode<synchronous>, transform_indices = @transform_7, window_bounds = array<i64: 128, 128>}, {pipeline_mode = #tpu.pipeline_mode<synchronous>, transform_indices = @transform_8, window_bounds = array<i64: 1, 128>}, {pipeline_mode = #tpu.pipeline_mode<synchronous>, transform_indices = @transform_9, window_bounds = array<i64: 128, 128>}, {pipeline_mode = #tpu.pipeline_mode<synchronous>, transform_indices = @transform_10, window_bounds = array<i64: 1, 128>}, {pipeline_mode = #tpu.pipeline_mode<synchronous>, transform_indices = @transform_11, window_bounds = array<i64: 128, 784>}, {pipeline_mode = #tpu.pipeline_mode<synchronous>, transform_indices = @transform_12, window_bounds = array<i64: 1, 784>}, {transform_indices = @transform_13, window_bounds = array<i64: 8, 784>}]} {
    %c0 = arith.constant 0 : index
    %c0_0 = arith.constant 0 : index
    %0 = vector.load %arg1[%c0, %c0_0] : memref<8x784xf32, #tpu.memory_space<vmem>>, vector<8x784xf32>
    %c0_1 = arith.constant 0 : index
    %c0_2 = arith.constant 0 : index
    %1 = vector.load %arg2[%c0_1, %c0_2] : memref<784x128xf32, #tpu.memory_space<vmem>>, vector<784x128xf32>
    %cst = arith.constant dense<0.000000e+00> : vector<8x128xf32>
    %2 = tpu.matmul %0, %1, %cst {dimension_numbers = #tpu.dot_dimension_numbers<[1], [0], [0], [1], [0, 0, 1, 1], [], []>} : vector<8x784xf32>, vector<784x128xf32>, vector<8x128xf32> -> vector<8x128xf32>
    %c0_3 = arith.constant 0 : index
    %c0_4 = arith.constant 0 : index
    %3 = vector.load %arg3[%c0_3, %c0_4] : memref<1x128xf32, #tpu.memory_space<vmem>>, vector<1x128xf32>
    %4 = vector.broadcast %3 : vector<1x128xf32> to vector<8x128xf32>
    %5 = arith.addf %2, %4 : vector<8x128xf32>
    %cst_5 = arith.constant 0.000000e+00 : f32
    %6 = vector.broadcast %cst_5 : f32 to vector<8x128xf32>
    %7 = arith.maximumf %5, %6 : vector<8x128xf32>
    %c0_6 = arith.constant 0 : index
    %c0_7 = arith.constant 0 : index
    %8 = vector.load %arg4[%c0_6, %c0_7] : memref<128x128xf32, #tpu.memory_space<vmem>>, vector<128x128xf32>
    %cst_8 = arith.constant dense<0.000000e+00> : vector<8x128xf32>
    %9 = tpu.matmul %7, %8, %cst_8 {dimension_numbers = #tpu.dot_dimension_numbers<[1], [0], [0], [1], [0, 0, 1, 1], [], []>} : vector<8x128xf32>, vector<128x128xf32>, vector<8x128xf32> -> vector<8x128xf32>
    %c0_9 = arith.constant 0 : index
    %c0_10 = arith.constant 0 : index
    %10 = vector.load %arg5[%c0_9, %c0_10] : memref<1x128xf32, #tpu.memory_space<vmem>>, vector<1x128xf32>
    %11 = vector.broadcast %10 : vector<1x128xf32> to vector<8x128xf32>
    %12 = arith.addf %9, %11 : vector<8x128xf32>
    %cst_11 = arith.constant 0.000000e+00 : f32
    %13 = vector.broadcast %cst_11 : f32 to vector<8x128xf32>
    %14 = arith.maximumf %12, %13 : vector<8x128xf32>
    %c0_12 = arith.constant 0 : index
    %c0_13 = arith.constant 0 : index
    %15 = vector.load %arg6[%c0_12, %c0_13] : memref<128x128xf32, #tpu.memory_space<vmem>>, vector<128x128xf32>
    %cst_14 = arith.constant dense<0.000000e+00> : vector<8x128xf32>
    %16 = tpu.matmul %14, %15, %cst_14 {dimension_numbers = #tpu.dot_dimension_numbers<[1], [0], [0], [1], [0, 0, 1, 1], [], []>} : vector<8x128xf32>, vector<128x128xf32>, vector<8x128xf32> -> vector<8x128xf32>
    %c0_15 = arith.constant 0 : index
    %c0_16 = arith.constant 0 : index
    %17 = vector.load %arg7[%c0_15, %c0_16] : memref<1x128xf32, #tpu.memory_space<vmem>>, vector<1x128xf32>
    %18 = vector.broadcast %17 : vector<1x128xf32> to vector<8x128xf32>
    %19 = arith.addf %16, %18 : vector<8x128xf32>
    %cst_17 = arith.constant 0.000000e+00 : f32
    %20 = vector.broadcast %cst_17 : f32 to vector<8x128xf32>
    %21 = arith.maximumf %19, %20 : vector<8x128xf32>
    %c0_18 = arith.constant 0 : index
    %c0_19 = arith.constant 0 : index
    %22 = vector.load %arg8[%c0_18, %c0_19] : memref<128x128xf32, #tpu.memory_space<vmem>>, vector<128x128xf32>
    %cst_20 = arith.constant dense<0.000000e+00> : vector<8x128xf32>
    %23 = tpu.matmul %21, %22, %cst_20 {dimension_numbers = #tpu.dot_dimension_numbers<[1], [0], [0], [1], [0, 0, 1, 1], [], []>} : vector<8x128xf32>, vector<128x128xf32>, vector<8x128xf32> -> vector<8x128xf32>
    %c0_21 = arith.constant 0 : index
    %c0_22 = arith.constant 0 : index
    %24 = vector.load %arg9[%c0_21, %c0_22] : memref<1x128xf32, #tpu.memory_space<vmem>>, vector<1x128xf32>
    %25 = vector.broadcast %24 : vector<1x128xf32> to vector<8x128xf32>
    %26 = arith.addf %23, %25 : vector<8x128xf32>
    %cst_23 = arith.constant 0.000000e+00 : f32
    %27 = vector.broadcast %cst_23 : f32 to vector<8x128xf32>
    %28 = arith.maximumf %26, %27 : vector<8x128xf32>
    %c0_24 = arith.constant 0 : index
    %c0_25 = arith.constant 0 : index
    %29 = vector.load %arg10[%c0_24, %c0_25] : memref<128x128xf32, #tpu.memory_space<vmem>>, vector<128x128xf32>
    %cst_26 = arith.constant dense<0.000000e+00> : vector<8x128xf32>
    %30 = tpu.matmul %28, %29, %cst_26 {dimension_numbers = #tpu.dot_dimension_numbers<[1], [0], [0], [1], [0, 0, 1, 1], [], []>} : vector<8x128xf32>, vector<128x128xf32>, vector<8x128xf32> -> vector<8x128xf32>
    %c0_27 = arith.constant 0 : index
    %c0_28 = arith.constant 0 : index
    %31 = vector.load %arg11[%c0_27, %c0_28] : memref<1x128xf32, #tpu.memory_space<vmem>>, vector<1x128xf32>
    %32 = vector.broadcast %31 : vector<1x128xf32> to vector<8x128xf32>
    %33 = arith.addf %30, %32 : vector<8x128xf32>
    %cst_29 = arith.constant 0.000000e+00 : f32
    %34 = vector.broadcast %cst_29 : f32 to vector<8x128xf32>
    %35 = arith.maximumf %33, %34 : vector<8x128xf32>
    %c0_30 = arith.constant 0 : index
    %c0_31 = arith.constant 0 : index
    %36 = vector.load %arg12[%c0_30, %c0_31] : memref<128x784xf32, #tpu.memory_space<vmem>>, vector<128x784xf32>
    %cst_32 = arith.constant dense<0.000000e+00> : vector<8x784xf32>
    %37 = tpu.matmul %35, %36, %cst_32 {dimension_numbers = #tpu.dot_dimension_numbers<[1], [0], [0], [1], [0, 0, 1, 1], [], []>} : vector<8x128xf32>, vector<128x784xf32>, vector<8x784xf32> -> vector<8x784xf32>
    %c0_33 = arith.constant 0 : index
    %c0_34 = arith.constant 0 : index
    %38 = vector.load %arg13[%c0_33, %c0_34] : memref<1x784xf32, #tpu.memory_space<vmem>>, vector<1x784xf32>
    %39 = vector.broadcast %38 : vector<1x784xf32> to vector<8x784xf32>
    %40 = arith.addf %37, %39 : vector<8x784xf32>
    %41 = math.tanh %40 : vector<8x784xf32>
    %c0_35 = arith.constant 0 : index
    %c0_36 = arith.constant 0 : index
    %42 = vector.load %arg14[%c0_35, %c0_36] : memref<8x784xf32, #tpu.memory_space<vmem>>, vector<8x784xf32>
    tpu.vector_store %arg14[%c0_35, %c0_36], %41 {strides = array<i32>} : memref<8x784xf32, #tpu.memory_space<vmem>>, vector<8x784xf32>,
    return
  }
  func.func @transform_0(%arg0: i32) -> (i32, i32) {
    %c0_i32 = arith.constant 0 : i32
    %c0_i32_0 = arith.constant 0 : i32
    return %arg0, %c0_i32 : i32, i32
  }
  func.func @transform_1(%arg0: i32) -> (i32, i32) {
    %c0_i32 = arith.constant 0 : i32
    %c0_i32_0 = arith.constant 0 : i32
    %c0_i32_1 = arith.constant 0 : i32
    return %c0_i32, %c0_i32_0 : i32, i32
  }
  func.func @transform_2(%arg0: i32) -> (i32, i32) {
    %c0_i32 = arith.constant 0 : i32
    %c0_i32_0 = arith.constant 0 : i32
    %c0_i32_1 = arith.constant 0 : i32
    return %c0_i32, %c0_i32_0 : i32, i32
  }
  func.func @transform_3(%arg0: i32) -> (i32, i32) {
    %c0_i32 = arith.constant 0 : i32
    %c0_i32_0 = arith.constant 0 : i32
    %c0_i32_1 = arith.constant 0 : i32
    return %c0_i32, %c0_i32_0 : i32, i32
  }
  func.func @transform_4(%arg0: i32) -> (i32, i32) {
    %c0_i32 = arith.constant 0 : i32
    %c0_i32_0 = arith.constant 0 : i32
    %c0_i32_1 = arith.constant 0 : i32
    return %c0_i32, %c0_i32_0 : i32, i32
  }
  func.func @transform_5(%arg0: i32) -> (i32, i32) {
    %c0_i32 = arith.constant 0 : i32
    %c0_i32_0 = arith.constant 0 : i32
    %c0_i32_1 = arith.constant 0 : i32
    return %c0_i32, %c0_i32_0 : i32, i32
  }
  func.func @transform_6(%arg0: i32) -> (i32, i32) {
    %c0_i32 = arith.constant 0 : i32
    %c0_i32_0 = arith.constant 0 : i32
    %c0_i32_1 = arith.constant 0 : i32
    return %c0_i32, %c0_i32_0 : i32, i32
  }
  func.func @transform_7(%arg0: i32) -> (i32, i32) {
    %c0_i32 = arith.constant 0 : i32
    %c0_i32_0 = arith.constant 0 : i32
    %c0_i32_1 = arith.constant 0 : i32
    return %c0_i32, %c0_i32_0 : i32, i32
  }
  func.func @transform_8(%arg0: i32) -> (i32, i32) {
    %c0_i32 = arith.constant 0 : i32
    %c0_i32_0 = arith.constant 0 : i32
    %c0_i32_1 = arith.constant 0 : i32
    return %c0_i32, %c0_i32_0 : i32, i32
  }
  func.func @transform_9(%arg0: i32) -> (i32, i32) {
    %c0_i32 = arith.constant 0 : i32
    %c0_i32_0 = arith.constant 0 : i32
    %c0_i32_1 = arith.constant 0 : i32
    return %c0_i32, %c0_i32_0 : i32, i32
  }
  func.func @transform_10(%arg0: i32) -> (i32, i32) {
    %c0_i32 = arith.constant 0 : i32
    %c0_i32_0 = arith.constant 0 : i32
    %c0_i32_1 = arith.constant 0 : i32
    return %c0_i32, %c0_i32_0 : i32, i32
  }
  func.func @transform_11(%arg0: i32) -> (i32, i32) {
    %c0_i32 = arith.constant 0 : i32
    %c0_i32_0 = arith.constant 0 : i32
    %c0_i32_1 = arith.constant 0 : i32
    return %c0_i32, %c0_i32_0 : i32, i32
  }
  func.func @transform_12(%arg0: i32) -> (i32, i32) {
    %c0_i32 = arith.constant 0 : i32
    %c0_i32_0 = arith.constant 0 : i32
    %c0_i32_1 = arith.constant 0 : i32
    return %c0_i32, %c0_i32_0 : i32, i32
  }
  func.func @transform_13(%arg0: i32) -> (i32, i32) {
    %c0_i32 = arith.constant 0 : i32
    %c0_i32_0 = arith.constant 0 : i32
    return %arg0, %c0_i32 : i32, i32
  }
}

</mosaic_0001>

<bundles_post_ra>
// kernel: autoencoder_forward.1
= control target key start
LH: loop header
LB: loop body
LE: loop exit
PB: predicated region body
PF: predicated region fallthrough
CT: control target
= control target key end

     0   :  { %s3027_s0 = inlined_call_operand.vmem [shape: f32[8,784], index: 0, kind: input, shape index: {}]   ;;  %s3028_s1 = inlined_call_operand.vmem [shape: f32[784,128], index: 1, kind: input, shape index: {}]   ;;  %s3029_s2 = inlined_call_operand.vmem [shape: f32[1,128], index: 2, kind: input, shape index: {}]   ;;  %s3030_s3 = inlined_call_operand.vmem [shape: f32[128,128], index: 3, kind: input, shape index: {}]   ;;  %s3031_s4 = inlined_call_operand.vmem [shape: f32[1,128], index: 4, kind: input, shape index: {}]   ;;  %s3032_s5 = inlined_call_operand.vmem [shape: f32[128,128], index: 5, kind: input, shape index: {}]   ;;  %s3033_s6 = inlined_call_operand.vmem [shape: f32[1,128], index: 6, kind: input, shape index: {}]   ;;  %s3034_s7 = inlined_call_operand.vmem [shape: f32[128,128], index: 7, kind: input, shape index: {}]   ;;  %s3035_s8 = inlined_call_operand.vmem [shape: f32[1,128], index: 8, kind: input, shape index: {}]   ;;  %s3036_s9 = inlined_call_operand.vmem [shape: f32[128,128], index: 9, kind: input, shape index: {}]   ;;  %s3037_s10 = inlined_call_operand.vmem [shape: f32[1,128], index: 10, kind: input, shape index: {}]   ;;  %s3038_s11 = inlined_call_operand.vmem [shape: f32[128,784], index: 11, kind: input, shape index: {}]   ;;  %s3039_s12 = inlined_call_operand.vmem [shape: f32[1,784], index: 12, kind: input, shape index: {}]   ;;  %s3040_s13 = inlined_call_operand.hbm [shape: f32[8,784], index: 13, kind: output, shape index: {}]  }
   0x1   :  { %v68_v0 = vld [vmem:[%s3028_s1 + $0x80] sm:$0xff]  ;;  %v69_v1 = vld [vmem:[%s3028_s1 + $0x88] sm:$0xff]  ;;  %v70_v11 = vld [vmem:[%s3028_s1 + $0x90] sm:$0xff] }
   0x2   :  { %v52_v2 = vld [vmem:[%s3028_s1] sm:$0xff]  ;;  %v1659_v3 = vpack.c.bf16 %v69_v1, %v68_v0  ;;  %v53_v4 = vld [vmem:[%s3028_s1 + $0x8] sm:$0xff]  ;;  %v71_v13 = vld [vmem:[%s3028_s1 + $0x98] sm:$0xff] }
   0x3   :  { %v100_v5 = vld [vmem:[%s3028_s1 + $0x180] sm:$0xff]  ;;  %v101_v6 = vld [vmem:[%s3028_s1 + $0x188] sm:$0xff]  ;;  %v1661_v7 = vpack.c.bf16 %v53_v4, %v52_v2  ;;  %v54_v14 = vld [vmem:[%s3028_s1 + $0x10] sm:$0xff]  ;;  %v1663_v16 = vpack.c.bf16 %v71_v13, %v70_v11 }
   0x4   :  { %v1691_v8 = vpack.c.bf16 %v101_v6, %v100_v5  ;;  %v84_v9 = vld [vmem:[%s3028_s1 + $0x100] sm:$0xff]  ;;  %v85_v10 = vld [vmem:[%s3028_s1 + $0x108] sm:$0xff]  ;;  %1660 = vmatprep.subr.bf16.mxu0 %v1659_v3  ;;  %v55_v15 = vld [vmem:[%s3028_s1 + $0x18] sm:$0xff] }
   0x5   :  { %v1693_v12 = vpack.c.bf16 %v85_v10, %v84_v9  ;;  %1662 = vmatpush3.bf16.msra.mxu0 %v1661_v7  ;;  %v1665_v17 = vpack.c.bf16 %v55_v15, %v54_v14  ;;  %v102_v18 = vld [vmem:[%s3028_s1 + $0x190] sm:$0xff]  ;;  %v103_v19 = vld [vmem:[%s3028_s1 + $0x198] sm:$0xff]  ;;  %v72_v23 = vld [vmem:[%s3028_s1 + $0xa0] sm:$0xff] }
   0x6   :  { %1692 = vmatprep.subr.bf16.mxu1 %v1691_v8  ;;  %v86_v20 = vld [vmem:[%s3028_s1 + $0x110] sm:$0xff]  ;;  %v1695_v21 = vpack.c.bf16 %v103_v19, %v102_v18  ;;  %v87_v22 = vld [vmem:[%s3028_s1 + $0x118] sm:$0xff]  ;;  %v73_v24 = vld [vmem:[%s3028_s1 + $0xa8] sm:$0xff]  ;;  %1664 = vmatprep.subr.bf16.mxu0 %v1663_v16 }
   0x7   :  { %1694 = vmatpush3.bf16.msra.mxu1 %v1693_v12  ;;  %v1697_v25 = vpack.c.bf16 %v87_v22, %v86_v20  ;;  %v1667_v26 = vpack.c.bf16 %v73_v24, %v72_v23  ;;  %v56_v27 = vld [vmem:[%s3028_s1 + $0x20] sm:$0xff]  ;;  %v57_v28 = vld [vmem:[%s3028_s1 + $0x28] sm:$0xff]  ;;  %v74_v35 = vld [vmem:[%s3028_s1 + $0xb0] sm:$0xff] }
   0x8   :  { %v104_v29 = vld [vmem:[%s3028_s1 + $0x1a0] sm:$0xff]  ;;  %1696 = vmatprep.subr.bf16.mxu1 %v1695_v21  ;;  %v105_v30 = vld [vmem:[%s3028_s1 + $0x1a8] sm:$0xff]  ;;  %v1669_v33 = vpack.c.bf16 %v57_v28, %v56_v27  ;;  %v75_v36 = vld [vmem:[%s3028_s1 + $0xb8] sm:$0xff] }
   0x9   :  { %v88_v31 = vld [vmem:[%s3028_s1 + $0x120] sm:$0xff]  ;;  %v89_v32 = vld [vmem:[%s3028_s1 + $0x128] sm:$0xff]  ;;  %1666 = vmatpush3.bf16.msra.mxu0 %v1665_v17  ;;  %v1699_v34 = vpack.c.bf16 %v105_v30, %v104_v29  ;;  %v58_v37 = vld [vmem:[%s3028_s1 + $0x30] sm:$0xff]  ;;  %v1671_v39 = vpack.c.bf16 %v75_v36, %v74_v35 }
   0xa   :  { %1668 = vmatprep.subr.bf16.mxu0 %v1667_v26  ;;  %v1701_v38 = vpack.c.bf16 %v89_v32, %v88_v31  ;;  %v59_v40 = vld [vmem:[%s3028_s1 + $0x38] sm:$0xff]  ;;  %v106_v41 = vld [vmem:[%s3028_s1 + $0x1b0] sm:$0xff]  ;;  %v76_v46 = vld [vmem:[%s3028_s1 + $0xc0] sm:$0xff] }
   0xb   :  { %1698 = vmatpush3.bf16.msra.mxu1 %v1697_v25  ;;  %v107_v42 = vld [vmem:[%s3028_s1 + $0x1b8] sm:$0xff]  ;;  %v90_v44 = vld [vmem:[%s3028_s1 + $0x130] sm:$0xff]  ;;  %v77_v47 = vld [vmem:[%s3028_s1 + $0xc8] sm:$0xff]  ;;  %v1673_v48 = vpack.c.bf16 %v59_v40, %v58_v37 }
   0xc   :  { %1700 = vmatprep.subr.bf16.mxu1 %v1699_v34  ;;  %v1703_v43 = vpack.c.bf16 %v107_v42, %v106_v41  ;;  %v91_v45 = vld [vmem:[%s3028_s1 + $0x138] sm:$0xff]  ;;  %v108_v49 = vld [vmem:[%s3028_s1 + $0x1c0] sm:$0xff]  ;;  %v109_v50 = vld [vmem:[%s3028_s1 + $0x1c8] sm:$0xff]  ;;  %v1675_v52 = vpack.c.bf16 %v77_v47, %v76_v46 }
   0xd   :  { %1670 = vmatpush3.bf16.msra.mxu0 %v1669_v33  ;;  %v1705_v51 = vpack.c.bf16 %v91_v45, %v90_v44  ;;  %v60_v53 = vld [vmem:[%s3028_s1 + $0x40] sm:$0xff]  ;;  %v61_v54 = vld [vmem:[%s3028_s1 + $0x48] sm:$0xff]  ;;  %v1707_v56 = vpack.c.bf16 %v109_v50, %v108_v49  ;;  %v78_v58 = vld [vmem:[%s3028_s1 + $0xd0] sm:$0xff]  ;;  %v2016_v50 = vmov 0.0|0.0  }
   0xe   :  { %1672 = vmatprep.subr.bf16.mxu0 %v1671_v39  ;;  %v92_v55 = vld [vmem:[%s3028_s1 + $0x140] sm:$0xff]  ;;  %v93_v57 = vld [vmem:[%s3028_s1 + $0x148] sm:$0xff]  ;;  %v79_v59 = vld [vmem:[%s3028_s1 + $0xd8] sm:$0xff]  ;;  %v1677_v62 = vpack.c.bf16 %v61_v54, %v60_v53 }
   0xf   :  { %1702 = vmatpush3.bf16.msra.mxu1 %v1701_v38  ;;  %v110_v60 = vld [vmem:[%s3028_s1 + $0x1d0] sm:$0xff]  ;;  %v111_v61 = vld [vmem:[%s3028_s1 + $0x1d8] sm:$0xff]  ;;  %v1709_v63 = vpack.c.bf16 %v93_v57, %v92_v55  ;;  %v1679_v0 = vpack.c.bf16 %v79_v59, %v78_v58  ;;  %v80_v6 = vld [vmem:[%s3028_s1 + $0xe0] sm:$0xff] }
  0x10   :  { %1704 = vmatprep.subr.bf16.mxu1 %v1703_v43  ;;  %v62_v1 = vld [vmem:[%s3028_s1 + $0x50] sm:$0xff]  ;;  %v63_v2 = vld [vmem:[%s3028_s1 + $0x58] sm:$0xff]  ;;  %v1711_v4 = vpack.c.bf16 %v111_v61, %v110_v60  ;;  %v81_v7 = vld [vmem:[%s3028_s1 + $0xe8] sm:$0xff] }
  0x11   :  { %1674 = vmatpush3.bf16.msra.mxu0 %v1673_v48  ;;  %v94_v3 = vld [vmem:[%s3028_s1 + $0x150] sm:$0xff]  ;;  %v95_v5 = vld [vmem:[%s3028_s1 + $0x158] sm:$0xff]  ;;  %v112_v8 = vld [vmem:[%s3028_s1 + $0x1e0] sm:$0xff]  ;;  %v1681_v10 = vpack.c.bf16 %v63_v2, %v62_v1  ;;  %v1683_v14 = vpack.c.bf16 %v81_v7, %v80_v6 }
  0x12   :  { %1676 = vmatprep.subr.bf16.mxu0 %v1675_v52  ;;  %v113_v9 = vld [vmem:[%s3028_s1 + $0x1e8] sm:$0xff]  ;;  %v64_v11 = vld [vmem:[%s3028_s1 + $0x60] sm:$0xff]  ;;  %v1713_v13 = vpack.c.bf16 %v95_v5, %v94_v3  ;;  %v82_v19 = vld [vmem:[%s3028_s1 + $0xf0] sm:$0xff] }
  0x13   :  { %1706 = vmatpush3.bf16.msra.mxu1 %v1705_v51  ;;  %v46_v12 = vld [vmem:[%s3027_s0 + $0x8] sm:$0xff]  ;;  %v96_v16 = vld [vmem:[%s3028_s1 + $0x160] sm:$0xff]  ;;  %v1715_v18 = vpack.c.bf16 %v113_v9, %v112_v8  ;;  %v83_v20 = vld [vmem:[%s3028_s1 + $0xf8] sm:$0xff] }
  0x14   :  { %1708 = vmatprep.subr.bf16.mxu1 %v1707_v56  ;;  %v65_v15 = vld [vmem:[%s3028_s1 + $0x68] sm:$0xff]  ;;  %225 = vmatprep.mubr.f32.mxu0 %v46_v12  ;;  %v48_v21 = vld [vmem:[%s3027_s0 + $0x18] sm:$0xff]  ;;  %v114_v22 = vld [vmem:[%s3028_s1 + $0x1f0] sm:$0xff]  ;;  %v1687_v26 = vpack.c.bf16 %v83_v20, %v82_v19 }
  0x15   :  { %1678 = vmatpush3.bf16.msra.mxu0 %v1677_v62  ;;  %v97_v17 = vld [vmem:[%s3028_s1 + $0x168] sm:$0xff]  ;;  %v115_v23 = vld [vmem:[%s3028_s1 + $0x1f8] sm:$0xff]  ;;  %295 = vmatprep.mubr.f32.mxu1 %v48_v21  ;;  %v1685_v24 = vpack.c.bf16 %v65_v15, %v64_v11  ;;  %v66_v27 = vld [vmem:[%s3028_s1 + $0x70] sm:$0xff] }
  0x16   :  { %1680 = vmatprep.subr.bf16.mxu0 %v1679_v0  ;;  %v1717_v25 = vpack.c.bf16 %v97_v17, %v96_v16  ;;  %v67_v28 = vld [vmem:[%s3028_s1 + $0x78] sm:$0xff]  ;;  %v98_v29 = vld [vmem:[%s3028_s1 + $0x170] sm:$0xff]  ;;  %v1719_v30 = vpack.c.bf16 %v115_v23, %v114_v22  ;;  %v132_v32 = vld [vmem:[%s3028_s1 + $0x280] sm:$0xff] }
  0x17   :  { %1710 = vmatpush3.bf16.msra.mxu1 %v1709_v63  ;;  %v99_v31 = vld [vmem:[%s3028_s1 + $0x178] sm:$0xff]  ;;  %v133_v33 = vld [vmem:[%s3028_s1 + $0x288] sm:$0xff]  ;;  %v1689_v34 = vpack.c.bf16 %v67_v28, %v66_v27  ;;  %v116_v37 = vld [vmem:[%s3028_s1 + $0x200] sm:$0xff] }
  0x18   :  { %1712 = vmatprep.subr.bf16.mxu1 %v1711_v4  ;;  %v1721_v35 = vpack.c.bf16 %v99_v31, %v98_v29  ;;  %v1723_v36 = vpack.c.bf16 %v133_v33, %v132_v32  ;;  %v117_v38 = vld [vmem:[%s3028_s1 + $0x208] sm:$0xff]  ;;  %v134_v39 = vld [vmem:[%s3028_s1 + $0x290] sm:$0xff]  ;;  %v135_v40 = vld [vmem:[%s3028_s1 + $0x298] sm:$0xff] }
  0x19   :  { %1682 = vmatpush3.bf16.msra.mxu0 %v1681_v10  ;;  %v45_v41 = vld [vmem:[%s3027_s0] sm:$0xff]  ;;  %v1725_v42 = vpack.c.bf16 %v117_v38, %v116_v37  ;;  %v47_v43 = vld [vmem:[%s3027_s0 + $0x10] sm:$0xff]  ;;  %v1727_v45 = vpack.c.bf16 %v135_v40, %v134_v39  ;;  %v119_v46 = vld [vmem:[%s3028_s1 + $0x218] sm:$0xff] }
  0x1a   :  { %1684 = vmatprep.subr.bf16.mxu0 %v1683_v14  ;;  %v118_v44 = vld [vmem:[%s3028_s1 + $0x210] sm:$0xff]  ;;  %v136_v47 = vld [vmem:[%s3028_s1 + $0x2a0] sm:$0xff]  ;;  %v137_v48 = vld [vmem:[%s3028_s1 + $0x2a8] sm:$0xff] }
  0x1b   :  { %1714 = vmatpush3.bf16.msra.mxu1 %v1713_v13  ;;  %v50_v49 = vld [vmem:[%s3027_s0 + $0x28] sm:$0xff]  ;;  %v148_v51 = vld [vmem:[%s3028_s1 + $0x300] sm:$0xff] }
  0x1c   :  { %1716 = vmatprep.subr.bf16.mxu1 %v1715_v18  ;;  %v149_v52 = vld [vmem:[%s3028_s1 + $0x308] sm:$0xff] }
  0x1d   :  { %1686 = vmatpush3.bf16.msra.mxu0 %v1685_v24  ;;  %v1756_v53 = vpack.c.bf16 %v149_v52, %v148_v51 }
  0x1e   :  { %1688 = vmatprep.subr.bf16.mxu0 %v1687_v26 }
  0x1f   :  { %1718 = vmatpush3.bf16.msra.mxu1 %v1717_v25 }
  0x20   :  { %1720 = vmatprep.subr.bf16.mxu1 %v1719_v30 }
  0x21   :  { %1690 = vmatpush3.bf16.msra.mxu0 %v1689_v34 }
  0x22   :  { %1724 = vmatprep.subr.bf16.mxu0 %v1723_v36 }
  0x23   :  { %1722 = vmatpush3.bf16.msra.mxu1 %v1721_v35 }
  0x24   :  { %1755 = vmatprep.subr.bf16.mxu1 %v2016_v50  ;;  %226 = vmatmul.mubr.f32.vlgmr.msra.gmra.mrb[0].mxu0 %v45_v41 }
  0x25   :  { %18 = vsyncpa [#allocation3], 0  ;;  %1726 = vmatpush3.bf16.msra.mxu0 %v1725_v42  ;;  %v1729_v54 = vpack.c.bf16 %v119_v46, %v118_v44  ;;  %v1731_v55 = vpack.c.bf16 %v137_v48, %v136_v47  ;;  %v120_v56 = vld [vmem:[%s3028_s1 + $0x220] sm:$0xff]  ;;  %v121_v57 = vld [vmem:[%s3028_s1 + $0x228] sm:$0xff]  ;;  %365 = vmatprep.mubr.f32.mxu0 %v50_v49  ;;  %vm2017_vm0 = vmmov 0   ;;  %v2018_v60 = vmov 0.0  }
  0x26   :  { %296 = vmatmul.mubr.f32.vlgmr.msra.gmra.mrb[0].mxu1 %v47_v43  ;;  %1728 = vmatprep.subr.bf16.mxu0 %v1727_v45  ;;  %v138_v58 = vld [vmem:[%s3028_s1 + $0x2b0] sm:$0xff]  ;;  %v139_v59 = vld [vmem:[%s3028_s1 + $0x2b8] sm:$0xff]  ;;  %vm157_vm1 = vcmask 130048   ;;  %v1733_v62 = vpack.c.bf16 %v121_v57, %v120_v56  ;;  %v140_v2 = vld [vmem:[%s3028_s1 + $0x2c0] sm:$0xff] }
  0x27   :  { %1757 = vmatpush3.bf16.msra.mxu1 %v1756_v53  ;;  %1481 = vmatprep.mubr.msk.f32.mxu1 %vm2017_vm0, %v2018_v60  ;;  %v51_v61 = vld [vmem:[%s3027_s0 + $0x30] sm:$0xff]  ;;  %v1735_v63 = vpack.c.bf16 %v139_v59, %v138_v58  ;;  %v123_v1 = vld [vmem:[%s3028_s1 + $0x238] sm:$0xff]  ;;  %v141_v3 = vld [vmem:[%s3028_s1 + $0x2c8] sm:$0xff] }
  0x28   :  { %1758 = vmatprep.subr.bf16.mxu1 %v2016_v50  ;;  %v122_v0 = vld [vmem:[%s3028_s1 + $0x230] sm:$0xff]  ;;  %v1739_v5 = vpack.c.bf16 %v141_v3, %v140_v2  ;;  %v124_v6 = vld [vmem:[%s3028_s1 + $0x240] sm:$0xff]  ;;  %v125_v7 = vld [vmem:[%s3028_s1 + $0x248] sm:$0xff] }
  0x29   :  { %1730 = vmatpush3.bf16.msra.mxu0 %v1729_v54  ;;  %v1737_v4 = vpack.c.bf16 %v123_v1, %v122_v0  ;;  %v142_v8 = vld [vmem:[%s3028_s1 + $0x2d0] sm:$0xff]  ;;  %v143_v9 = vld [vmem:[%s3028_s1 + $0x2d8] sm:$0xff]  ;;  %v1741_v10 = vpack.c.bf16 %v125_v7, %v124_v6  ;;  %v144_v14 = vld [vmem:[%s3028_s1 + $0x2e0] sm:$0xff] }
  0x2a   :  { %1732 = vmatprep.subr.bf16.mxu0 %v1731_v55  ;;  %1482 = vmatmul.mubr.msk.f32.vlgmr.msra.gmra.mrb[2].mxu1 %vm157_vm1, %v51_v61  ;;  %v1743_v11 = vpack.c.bf16 %v143_v9, %v142_v8  ;;  %v126_v12 = vld [vmem:[%s3028_s1 + $0x250] sm:$0xff]  ;;  %v127_v13 = vld [vmem:[%s3028_s1 + $0x258] sm:$0xff]  ;;  %v145_v15 = vld [vmem:[%s3028_s1 + $0x2e8] sm:$0xff] }
  0x2b   :  { %1516 = vmatprep.mubr.msk.f32.mxu1 %vm2017_vm0, %v2018_v60  ;;  %v1745_v16 = vpack.c.bf16 %v127_v13, %v126_v12  ;;  %v1747_v17 = vpack.c.bf16 %v145_v15, %v144_v14  ;;  %v128_v18 = vld [vmem:[%s3028_s1 + $0x260] sm:$0xff]  ;;  %v129_v19 = vld [vmem:[%s3028_s1 + $0x268] sm:$0xff]  ;;  %v146_v20 = vld [vmem:[%s3028_s1 + $0x2f0] sm:$0xff] }
  0x2c   :  { %v147_v21 = vld [vmem:[%s3028_s1 + $0x2f8] sm:$0xff]  ;;  %v1749_v22 = vpack.c.bf16 %v129_v19, %v128_v18  ;;  %v130_v24 = vld [vmem:[%s3028_s1 + $0x270] sm:$0xff]  ;;  %v49_v27 = vld [vmem:[%s3027_s0 + $0x20] sm:$0xff] }
  0x2d   :  { %1734 = vmatpush3.bf16.msra.mxu0 %v1733_v62  ;;  %v1751_v23 = vpack.c.bf16 %v147_v21, %v146_v20  ;;  %v131_v25 = vld [vmem:[%s3028_s1 + $0x278] sm:$0xff]  ;;  %v442_v28 = vld [vmem:[%s3030_s3] sm:$0xff]  ;;  %v443_v29 = vld [vmem:[%s3030_s3 + $0x8] sm:$0xff] }
  0x2e   :  { %1736 = vmatprep.subr.bf16.mxu0 %v1735_v63  ;;  %v1753_v26 = vpack.c.bf16 %v131_v25, %v130_v24  ;;  %v444_v30 = vld [vmem:[%s3030_s3 + $0x10] sm:$0xff]  ;;  %v1759_v31 = vpack.c.bf16 %v443_v29, %v442_v28  ;;  %v445_v32 = vld [vmem:[%s3030_s3 + $0x18] sm:$0xff]  ;;  %v446_v34 = vld [vmem:[%s3030_s3 + $0x20] sm:$0xff] }
  0x2f   :  { %v1762_v33 = vpack.c.bf16 %v445_v32, %v444_v30  ;;  %v447_v35 = vld [vmem:[%s3030_s3 + $0x28] sm:$0xff]  ;;  %v448_v37 = vld [vmem:[%s3030_s3 + $0x30] sm:$0xff]  ;;  %v449_v38 = vld [vmem:[%s3030_s3 + $0x38] sm:$0xff] }
  0x30   :  { %1760 = vmatpush3.bf16.msra.mxu1 %v1759_v31  ;;  %v1765_v36 = vpack.c.bf16 %v447_v35, %v446_v34  ;;  %v1768_v39 = vpack.c.bf16 %v449_v38, %v448_v37  ;;  %v450_v40 = vld [vmem:[%s3030_s3 + $0x40] sm:$0xff]  ;;  %v451_v41 = vld [vmem:[%s3030_s3 + $0x48] sm:$0xff]  ;;  %v452_v43 = vld [vmem:[%s3030_s3 + $0x50] sm:$0xff] }
  0x31   :  { %1738 = vmatpush3.bf16.msra.mxu0 %v1737_v4  ;;  %1761 = vmatprep.subr.bf16.mxu1 %v2016_v50  ;;  %v1771_v42 = vpack.c.bf16 %v451_v41, %v450_v40  ;;  %v453_v44 = vld [vmem:[%s3030_s3 + $0x58] sm:$0xff]  ;;  %v454_v46 = vld [vmem:[%s3030_s3 + $0x60] sm:$0xff]  ;;  %v455_v47 = vld [vmem:[%s3030_s3 + $0x68] sm:$0xff] }
  0x32   :  { %1740 = vmatprep.subr.bf16.mxu0 %v1739_v5  ;;  %v1774_v45 = vpack.c.bf16 %v453_v44, %v452_v43  ;;  %v1777_v48 = vpack.c.bf16 %v455_v47, %v454_v46  ;;  %v456_v49 = vld [vmem:[%s3030_s3 + $0x70] sm:$0xff]  ;;  %v457_v51 = vld [vmem:[%s3030_s3 + $0x78] sm:$0xff]  ;;  %v536_v53 = vld [vmem:[%s3032_s5] sm:$0xff] }
  0x33   :  { %v1780_v52 = vpack.c.bf16 %v457_v51, %v456_v49  ;;  %v537_v54 = vld [vmem:[%s3032_s5 + $0x8] sm:$0xff]  ;;  %v538_v55 = vld [vmem:[%s3032_s5 + $0x10] sm:$0xff]  ;;  %v539_v57 = vld [vmem:[%s3032_s5 + $0x18] sm:$0xff] }
  0x34   :  { %1763 = vmatpush3.bf16.msra.mxu1 %v1762_v33  ;;  %v1783_v56 = vpack.c.bf16 %v537_v54, %v536_v53  ;;  %v1786_v58 = vpack.c.bf16 %v539_v57, %v538_v55  ;;  %v540_v59 = vld [vmem:[%s3032_s5 + $0x20] sm:$0xff]  ;;  %v541_v61 = vld [vmem:[%s3032_s5 + $0x28] sm:$0xff]  ;;  %v542_v63 = vld [vmem:[%s3032_s5 + $0x30] sm:$0xff] }
  0x35   :  { %1742 = vmatpush3.bf16.msra.mxu0 %v1741_v10  ;;  %1764 = vmatprep.subr.bf16.mxu1 %v2016_v50  ;;  %v1789_v62 = vpack.c.bf16 %v541_v61, %v540_v59  ;;  %v543_v0 = vld [vmem:[%s3032_s5 + $0x38] sm:$0xff]  ;;  %v544_v2 = vld [vmem:[%s3032_s5 + $0x40] sm:$0xff]  ;;  %v545_v3 = vld [vmem:[%s3032_s5 + $0x48] sm:$0xff] }
  0x36   :  { %1744 = vmatprep.subr.bf16.mxu0 %v1743_v11  ;;  %v1792_v1 = vpack.c.bf16 %v543_v0, %v542_v63  ;;  %v1795_v4 = vpack.c.bf16 %v545_v3, %v544_v2  ;;  %v546_v5 = vld [vmem:[%s3032_s5 + $0x50] sm:$0xff]  ;;  %v547_v6 = vld [vmem:[%s3032_s5 + $0x58] sm:$0xff]  ;;  %v548_v8 = vld [vmem:[%s3032_s5 + $0x60] sm:$0xff] }
  0x37   :  { %v1798_v7 = vpack.c.bf16 %v547_v6, %v546_v5  ;;  %v549_v9 = vld [vmem:[%s3032_s5 + $0x68] sm:$0xff]  ;;  %v1278_v12 = vld [vmem:[%s3029_s2] ss:$0 sm:$0xff]  ;;  %v550_v28 = vld [vmem:[%s3032_s5 + $0x70] sm:$0xff] }
  0x38   :  { %1766 = vmatpush3.bf16.msra.mxu1 %v1765_v36  ;;  %v1801_v10 = vpack.c.bf16 %v549_v9, %v548_v8  ;;  %v551_v29 = vld [vmem:[%s3032_s5 + $0x78] sm:$0xff]  ;;  %v630_v31 = vld [vmem:[%s3034_s7] sm:$0xff]  ;;  %v631_v32 = vld [vmem:[%s3034_s7 + $0x8] sm:$0xff] }
  0x39   :  { %1746 = vmatpush3.bf16.msra.mxu0 %v1745_v16  ;;  %1767 = vmatprep.subr.bf16.mxu1 %v2016_v50  ;;  %v1804_v30 = vpack.c.bf16 %v551_v29, %v550_v28  ;;  %v632_v33 = vld [vmem:[%s3034_s7 + $0x10] sm:$0xff]  ;;  %v1807_v34 = vpack.c.bf16 %v631_v32, %v630_v31  ;;  %v633_v35 = vld [vmem:[%s3034_s7 + $0x18] sm:$0xff]  ;;  %v634_v37 = vld [vmem:[%s3034_s7 + $0x20] sm:$0xff] }
  0x3a   :  { %1748 = vmatprep.subr.bf16.mxu0 %v1747_v17  ;;  %v1810_v36 = vpack.c.bf16 %v633_v35, %v632_v33  ;;  %v635_v38 = vld [vmem:[%s3034_s7 + $0x28] sm:$0xff]  ;;  %v636_v40 = vld [vmem:[%s3034_s7 + $0x30] sm:$0xff]  ;;  %v637_v41 = vld [vmem:[%s3034_s7 + $0x38] sm:$0xff] }
  0x3b   :  { %v638_v43 = vld [vmem:[%s3034_s7 + $0x40] sm:$0xff]  ;;  %v639_v44 = vld [vmem:[%s3034_s7 + $0x48] sm:$0xff]  ;;  %v640_v46 = vld [vmem:[%s3034_s7 + $0x50] sm:$0xff] }
  0x3c   :  { %1769 = vmatpush3.bf16.msra.mxu1 %v1768_v39  ;;  %v1813_v39 = vpack.c.bf16 %v635_v38, %v634_v37  ;;  %v641_v47 = vld [vmem:[%s3034_s7 + $0x58] sm:$0xff]  ;;  %v642_v49 = vld [vmem:[%s3034_s7 + $0x60] sm:$0xff]  ;;  %v643_v51 = vld [vmem:[%s3034_s7 + $0x68] sm:$0xff] }
  0x3d   :  { %1750 = vmatpush3.bf16.msra.mxu0 %v1749_v22  ;;  %1770 = vmatprep.subr.bf16.mxu1 %v2016_v50  ;;  %v1280_v53 = vld [vmem:[%s3031_s4] ss:$0 sm:$0xff]  ;;  %v645_v59 = vld [vmem:[%s3034_s7 + $0x78] sm:$0xff]  ;;  %v725_v63 = vld [vmem:[%s3036_s9 + $0x8] sm:$0xff] }
  0x3e   :  { %1752 = vmatprep.subr.bf16.mxu0 %v1751_v23  ;;  %v726_v0 = vld [vmem:[%s3036_s9 + $0x10] sm:$0xff]  ;;  %v727_v2 = vld [vmem:[%s3036_s9 + $0x18] sm:$0xff]  ;;  %v729_v5 = vld [vmem:[%s3036_s9 + $0x28] sm:$0xff] }
  0x3f   :  { %v1834_v3 = vpack.c.bf16 %v727_v2, %v726_v0  ;;  %v731_v8 = vld [vmem:[%s3036_s9 + $0x38] sm:$0xff]  ;;  %v826_v28 = vld [vmem:[%s3038_s11 + $0x40] sm:$0xff]  ;;  %v828_v31 = vld [vmem:[%s3038_s11 + $0x50] sm:$0xff] }
  0x40   :  { %1772 = vmatpush3.bf16.msra.mxu1 %v1771_v42  ;;  %v1816_v42 = vpack.c.bf16 %v637_v41, %v636_v40  ;;  %v821_v29 = vld [vmem:[%s3038_s11 + $0x18] sm:$0xff]  ;;  %v818_v32 = vld [vmem:[%s3038_s11] sm:$0xff]  ;;  %v840_v37 = vld [vmem:[%s3038_s11 + $0xb0] sm:$0xff] }
  0x41   :  { %1754 = vmatpush3.bf16.msra.mxu0 %v1753_v26  ;;  %1773 = vmatprep.subr.bf16.mxu1 %v2016_v50  ;;  %v825_v33 = vld [vmem:[%s3038_s11 + $0x38] sm:$0xff]  ;;  %v839_v40 = vld [vmem:[%s3038_s11 + $0xa8] sm:$0xff] }
  0x42   :  { %1782 = vmatprep.subr.bf16.mxu0 %v2016_v50  ;;  %v1856_v35 = vpack.c.bf16 %v825_v33, %v818_v32  ;;  %v895_v2 = vld [vmem:[%s3038_s11 + $0x268] sm:$0xff]  ;;  %v862_v33 = vld [vmem:[%s3038_s11 + $0x160] sm:$0xff] }
  0x44   :  { %366 = vmatmul.mubr.f32.vlgmr.msra.gmra.mrb[2].mxu0 %v49_v27  ;;  %1775 = vmatpush3.bf16.msra.mxu1 %v1774_v45  ;;  %v1819_v45 = vpack.c.bf16 %v639_v44, %v638_v43  ;;  %v854_v43 = vld [vmem:[%s3038_s11 + $0x120] sm:$0xff] }
  0x45   :  { %1551 = vmatprep.mubr.msk.f32.mxu0 %vm2017_vm0, %v2018_v60  ;;  %1776 = vmatprep.subr.bf16.mxu1 %v2016_v50 }
  0x46   :  { %1784 = vmatpush3.bf16.msra.mxu0 %v1783_v56 }
  0x47   :  { %1785 = vmatprep.subr.bf16.mxu0 %v2016_v50 }
  0x48   :  { %1778 = vmatpush3.bf16.msra.mxu1 %v1777_v48  ;;  %v1822_v48 = vpack.c.bf16 %v641_v47, %v640_v46  ;;  %v853_v46 = vld [vmem:[%s3038_s11 + $0x118] sm:$0xff] }
  0x49   :  { %1779 = vmatprep.subr.bf16.mxu1 %v2016_v50 }
  0x4a   :  { %1787 = vmatpush3.bf16.msra.mxu0 %v1786_v58  ;;  %v644_v58 = vld [vmem:[%s3034_s7 + $0x70] sm:$0xff] }
  0x4b   :  { %1788 = vmatprep.subr.bf16.mxu0 %v2016_v50  ;;  %v1828_v61 = vpack.c.bf16 %v645_v59, %v644_v58  ;;  %v874_v58 = vld [vmem:[%s3038_s11 + $0x1c0] sm:$0xff]  ;;  %v881_v59 = vld [vmem:[%s3038_s11 + $0x1f8] sm:$0xff] }
  0x4c   :  { %1781 = vmatpush3.bf16.msra.mxu1 %v1780_v52  ;;  %v1825_v52 = vpack.c.bf16 %v643_v51, %v642_v49  ;;  %v868_v49 = vld [vmem:[%s3038_s11 + $0x190] sm:$0xff] }
  0x4d   :  { %1806 = vmatprep.subr.bf16.mxu1 %v2016_v50 }
  0x4e   :  { %1790 = vmatpush3.bf16.msra.mxu0 %v1789_v62  ;;  %v724_v62 = vld [vmem:[%s3036_s9] sm:$0xff] }
  0x4f   :  { %1791 = vmatprep.subr.bf16.mxu0 %v2016_v50 }
  0x52   :  { %1793 = vmatpush3.bf16.msra.mxu0 %v1792_v1  ;;  %v1831_v1 = vpack.c.bf16 %v725_v63, %v724_v62  ;;  %v889_v62 = vld [vmem:[%s3038_s11 + $0x238] sm:$0xff]  ;;  %v896_v63 = vld [vmem:[%s3038_s11 + $0x270] sm:$0xff] }
  0x53   :  { %1794 = vmatprep.subr.bf16.mxu0 %v2016_v50  ;;  %v1874_v0 = vpack.c.bf16 %v896_v63, %v889_v62  ;;  %v923_v62 = vld [vmem:[%s3038_s11 + $0x348] sm:$0xff] }
  0x56   :  { %1796 = vmatpush3.bf16.msra.mxu0 %v1795_v4  ;;  %v728_v4 = vld [vmem:[%s3036_s9 + $0x20] sm:$0xff] }
  0x57   :  { %1797 = vmatprep.subr.bf16.mxu0 %v2016_v50  ;;  %v1837_v6 = vpack.c.bf16 %v729_v5, %v728_v4  ;;  %v903_v4 = vld [vmem:[%s3038_s11 + $0x2a8] sm:$0xff]  ;;  %v910_v5 = vld [vmem:[%s3038_s11 + $0x2e0] sm:$0xff] }
  0x5a   :  { %1799 = vmatpush3.bf16.msra.mxu0 %v1798_v7  ;;  %v730_v7 = vld [vmem:[%s3036_s9 + $0x30] sm:$0xff] }
  0x5b   :  { %1800 = vmatprep.subr.bf16.mxu0 %v2016_v50  ;;  %v1840_v9 = vpack.c.bf16 %v731_v8, %v730_v7  ;;  %v902_v7 = vld [vmem:[%s3038_s11 + $0x2a0] sm:$0xff]  ;;  %v909_v8 = vld [vmem:[%s3038_s11 + $0x2d8] sm:$0xff] }
  0x5e   :  { %1802 = vmatpush3.bf16.msra.mxu0 %v1801_v10  ;;  %v732_v10 = vld [vmem:[%s3036_s9 + $0x40] sm:$0xff] }
  0x5f   :  { %1803 = vmatprep.subr.bf16.mxu0 %v2016_v50 }
  0x62   :  { %1805 = vmatpush3.bf16.msra.mxu0 %v1804_v30 }
  0x63   :  { %1830 = vmatprep.subr.bf16.mxu0 %v2016_v50 }
  0xf7   :  { %v1316_v11 = vpop.f32.mrb[0].mxu0 }
  0xf8   :  { %v1317_v13 = vpop.f32.mrb[1].mxu0 }
  0xf9   :  { %v1351_v14 = vpop.f32.mrb[0].mxu1  ;;  %v1318_v15 = vadd.f32 %v1317_v13, %v1316_v11  ;;  %v733_v11 = vld [vmem:[%s3036_s9 + $0x48] sm:$0xff]  ;;  %v734_v13 = vld [vmem:[%s3036_s9 + $0x50] sm:$0xff] }
  0xfa   :  { %v1352_v16 = vpop.f32.mrb[1].mxu1 }
  0xfb   :  { %v1353_v17 = vadd.f32 %v1352_v16, %v1351_v14  ;;  %v228_v18 = vadd.f32 %v1318_v15, %v1278_v12  ;;  %v1843_v12 = vpack.c.bf16 %v733_v11, %v732_v10  ;;  %v735_v14 = vld [vmem:[%s3036_s9 + $0x58] sm:$0xff]  ;;  %v736_v16 = vld [vmem:[%s3036_s9 + $0x60] sm:$0xff]  ;;  %v820_v11 = vld [vmem:[%s3038_s11 + $0x10] sm:$0xff] }
  0xfc   :  { %v1846_v15 = vpack.c.bf16 %v735_v14, %v734_v13  ;;  %v1282_v10 = vld [vmem:[%s3035_s8] ss:$0 sm:$0xff]  ;;  %v835_v14 = vld [vmem:[%s3038_s11 + $0x88] sm:$0xff] }
  0xfd   :  { %v298_v19 = vadd.f32 %v1353_v17, %v228_v18  ;;  %v437_v20 = vpop.f32.mrb[2].mxu1  ;;  %v737_v17 = vld [vmem:[%s3036_s9 + $0x68] sm:$0xff] }
  0xfe   :  { %v1483_v21 = vpop.f32.mrb[3].mxu1  ;;  %v1849_v18 = vpack.c.bf16 %v737_v17, %v736_v16 }
 0x117   :  { %v1386_v22 = vpop.f32.mrb[2].mxu0 }
 0x118   :  { %v1387_v23 = vpop.f32.mrb[3].mxu0 }
 0x119   :  { %v1388_v24 = vadd.f32 %v1387_v23, %v1386_v22 }
 0x11b   :  { %v368_v25 = vadd.f32 %v1388_v24, %v298_v19  ;;  %v1281_v19 = vld [vmem:[%s3033_s6] ss:$0 sm:$0xff]  ;;  %v738_v24 = vld [vmem:[%s3036_s9 + $0x70] sm:$0xff] }
 0x11d   :  { %v438_v26 = vadd.f32 %v437_v20, %v368_v25  ;;  %v739_v25 = vld [vmem:[%s3036_s9 + $0x78] sm:$0xff] }
 0x11f   :  { %v441_v27 = vmax.f32 %v438_v26, 0.0  ;;  %v1852_v26 = vpack.c.bf16 %v739_v25, %v738_v24  ;;  %v856_v24 = vld [vmem:[%s3038_s11 + $0x130] sm:$0xff] }
 0x121   :  { %1517 = vmatmul.mubr.f32.vlgmr.msra.gmra.mrb[4].mxu1 %v441_v27  ;;  %v819_v27 = vld [vmem:[%s3038_s11 + $0x8] sm:$0xff] }
 0x122   :  { %1586 = vmatprep.mubr.msk.f32.mxu1 %vm2017_vm0, %v2018_v60  ;;  %1808 = vmatpush3.bf16.msra.mxu1 %v1807_v34  ;;  %v1854_v30 = vpack.c.bf16 %v826_v28, %v819_v27  ;;  %v1886_v34 = vpack.c.bf16 %v828_v31, %v821_v29  ;;  %v848_v27 = vld [vmem:[%s3038_s11 + $0xf0] sm:$0xff]  ;;  %v855_v28 = vld [vmem:[%s3038_s11 + $0x128] sm:$0xff] }
 0x123   :  { %1809 = vmatprep.subr.bf16.mxu1 %v2016_v50  ;;  %v863_v29 = vld [vmem:[%s3038_s11 + $0x168] sm:$0xff]  ;;  %v1896_v31 = vpack.c.bf16 %v855_v28, %v848_v27 }
 0x126   :  { %1811 = vmatpush3.bf16.msra.mxu1 %v1810_v36  ;;  %v833_v36 = vld [vmem:[%s3038_s11 + $0x78] sm:$0xff] }
 0x127   :  { %1812 = vmatprep.subr.bf16.mxu1 %v2016_v50  ;;  %v1858_v38 = vpack.c.bf16 %v840_v37, %v833_v36  ;;  %v884_v36 = vld [vmem:[%s3038_s11 + $0x210] sm:$0xff] }
 0x12a   :  { %1814 = vmatpush3.bf16.msra.mxu1 %v1813_v39  ;;  %v832_v39 = vld [vmem:[%s3038_s11 + $0x70] sm:$0xff] }
 0x12b   :  { %1815 = vmatprep.subr.bf16.mxu1 %v2016_v50  ;;  %v1860_v41 = vpack.c.bf16 %v839_v40, %v832_v39  ;;  %v876_v39 = vld [vmem:[%s3038_s11 + $0x1d0] sm:$0xff]  ;;  %v883_v40 = vld [vmem:[%s3038_s11 + $0x208] sm:$0xff] }
 0x12e   :  { %1817 = vmatpush3.bf16.msra.mxu1 %v1816_v42  ;;  %v847_v42 = vld [vmem:[%s3038_s11 + $0xe8] sm:$0xff] }
 0x12f   :  { %1818 = vmatprep.subr.bf16.mxu1 %v2016_v50  ;;  %v1862_v44 = vpack.c.bf16 %v854_v43, %v847_v42  ;;  %v898_v42 = vld [vmem:[%s3038_s11 + $0x280] sm:$0xff]  ;;  %v1904_v43 = vpack.c.bf16 %v883_v40, %v876_v39  ;;  %v871_v40 = vld [vmem:[%s3038_s11 + $0x1a8] sm:$0xff] }
 0x132   :  { %1820 = vmatpush3.bf16.msra.mxu1 %v1819_v45  ;;  %v846_v45 = vld [vmem:[%s3038_s11 + $0xe0] sm:$0xff] }
 0x133   :  { %1821 = vmatprep.subr.bf16.mxu1 %v2016_v50  ;;  %v1864_v47 = vpack.c.bf16 %v853_v46, %v846_v45  ;;  %v890_v45 = vld [vmem:[%s3038_s11 + $0x240] sm:$0xff]  ;;  %v897_v46 = vld [vmem:[%s3038_s11 + $0x278] sm:$0xff] }
 0x136   :  { %1823 = vmatpush3.bf16.msra.mxu1 %v1822_v48  ;;  %v861_v48 = vld [vmem:[%s3038_s11 + $0x158] sm:$0xff] }
 0x137   :  { %1824 = vmatprep.subr.bf16.mxu1 %v2016_v50  ;;  %v1866_v51 = vpack.c.bf16 %v868_v49, %v861_v48  ;;  %v912_v48 = vld [vmem:[%s3038_s11 + $0x2f0] sm:$0xff]  ;;  %v1908_v49 = vpack.c.bf16 %v897_v46, %v890_v45  ;;  %v878_v46 = vld [vmem:[%s3038_s11 + $0x1e0] sm:$0xff] }
 0x13a   :  { %1826 = vmatpush3.bf16.msra.mxu1 %v1825_v52  ;;  %v860_v52 = vld [vmem:[%s3038_s11 + $0x150] sm:$0xff] }
 0x13b   :  { %1827 = vmatprep.subr.bf16.mxu1 %v2016_v50 }
 0x13e   :  { %1829 = vmatpush3.bf16.msra.mxu1 %v1828_v61  ;;  %v1872_v61 = vpack.c.bf16 %v881_v59, %v874_v58  ;;  %v926_v59 = vld [vmem:[%s3038_s11 + $0x360] sm:$0xff] }
 0x13f   :  { %1855 = vmatprep.subr.bf16.mxu1 %v1854_v30  ;;  %v870_v30 = vld [vmem:[%s3038_s11 + $0x1a0] sm:$0xff] }
 0x140   :  { %v1898_v32 = vpack.c.bf16 %v870_v30, %v863_v29  ;;  %v850_v29 = vld [vmem:[%s3038_s11 + $0x100] sm:$0xff] }
 0x1f4   :  { %v531_v54 = vpop.f32.mrb[4].mxu1 }
 0x1f5   :  { %v532_v55 = vadd.f32 %v1280_v53, %v531_v54  ;;  %v1518_v56 = vpop.f32.mrb[5].mxu1  ;;  %v867_v53 = vld [vmem:[%s3038_s11 + $0x188] sm:$0xff] }
 0x1f6   :  { %v1868_v54 = vpack.c.bf16 %v867_v53, %v860_v52  ;;  %v882_v56 = vld [vmem:[%s3038_s11 + $0x200] sm:$0xff]  ;;  %v904_v52 = vld [vmem:[%s3038_s11 + $0x2b0] sm:$0xff]  ;;  %v911_v53 = vld [vmem:[%s3038_s11 + $0x2e8] sm:$0xff] }
 0x1f7   :  { %v535_v57 = vmax.f32 %v532_v55, 0.0  ;;  %v875_v55 = vld [vmem:[%s3038_s11 + $0x1c8] sm:$0xff] }
 0x1f9   :  { %1552 = vmatmul.mubr.f32.vlgmr.msra.gmra.mrb[4].mxu0 %v535_v57  ;;  %v1870_v57 = vpack.c.bf16 %v882_v56, %v875_v55  ;;  %v917_v55 = vld [vmem:[%s3038_s11 + $0x318] sm:$0xff]  ;;  %v924_v56 = vld [vmem:[%s3038_s11 + $0x350] sm:$0xff] }
 0x1fa   :  { %1621 = vmatprep.mubr.msk.f32.mxu0 %vm2017_vm0, %v2018_v60  ;;  %1832 = vmatpush3.bf16.msra.mxu0 %v1831_v1  ;;  %v888_v1 = vld [vmem:[%s3038_s11 + $0x230] sm:$0xff]  ;;  %v1882_v58 = vpack.c.bf16 %v924_v56, %v917_v55 }
 0x1fb   :  { %1833 = vmatprep.subr.bf16.mxu0 %v2016_v50  ;;  %v892_v56 = vld [vmem:[%s3038_s11 + $0x250] sm:$0xff] }
 0x1fe   :  { %1835 = vmatpush3.bf16.msra.mxu0 %v1834_v3  ;;  %v1876_v3 = vpack.c.bf16 %v895_v2, %v888_v1  ;;  %v918_v1 = vld [vmem:[%s3038_s11 + $0x320] sm:$0xff]  ;;  %v925_v2 = vld [vmem:[%s3038_s11 + $0x358] sm:$0xff] }
 0x1ff   :  { %1836 = vmatprep.subr.bf16.mxu0 %v2016_v50 }
 0x202   :  { %1838 = vmatpush3.bf16.msra.mxu0 %v1837_v6  ;;  %v1878_v6 = vpack.c.bf16 %v910_v5, %v903_v4  ;;  %v823_v4 = vld [vmem:[%s3038_s11 + $0x28] sm:$0xff]  ;;  %v830_v5 = vld [vmem:[%s3038_s11 + $0x60] sm:$0xff] }
 0x203   :  { %1839 = vmatprep.subr.bf16.mxu0 %v2016_v50 }
 0x206   :  { %1841 = vmatpush3.bf16.msra.mxu0 %v1840_v9  ;;  %v1880_v9 = vpack.c.bf16 %v909_v8, %v902_v7  ;;  %v1283_v7 = vld [vmem:[%s3037_s10] ss:$0 sm:$0xff] }
 0x207   :  { %1842 = vmatprep.subr.bf16.mxu0 %v2016_v50  ;;  %v822_v8 = vld [vmem:[%s3038_s11 + $0x20] sm:$0xff] }
 0x20a   :  { %1844 = vmatpush3.bf16.msra.mxu0 %v1843_v12  ;;  %v827_v12 = vld [vmem:[%s3038_s11 + $0x48] sm:$0xff] }
 0x20b   :  { %1845 = vmatprep.subr.bf16.mxu0 %v2016_v50 }
 0x20e   :  { %1847 = vmatpush3.bf16.msra.mxu0 %v1846_v15  ;;  %v842_v15 = vld [vmem:[%s3038_s11 + $0xc0] sm:$0xff] }
 0x20f   :  { %1848 = vmatprep.subr.bf16.mxu0 %v2016_v50 }
 0x212   :  { %1850 = vmatpush3.bf16.msra.mxu0 %v1849_v18  ;;  %v1888_v18 = vpack.c.bf16 %v827_v12, %v820_v11  ;;  %v831_v11 = vld [vmem:[%s3038_s11 + $0x68] sm:$0xff] }
 0x213   :  { %1851 = vmatprep.subr.bf16.mxu0 %v2016_v50 }
 0x216   :  { %1853 = vmatpush3.bf16.msra.mxu0 %v1852_v26 }
 0x217   :  { %1887 = vmatprep.subr.bf16.mxu0 %v1886_v34  ;;  %v869_v34 = vld [vmem:[%s3038_s11 + $0x198] sm:$0xff] }
 0x218   :  { %v1900_v37 = vpack.c.bf16 %v869_v34, %v862_v33  ;;  %v859_v33 = vld [vmem:[%s3038_s11 + $0x148] sm:$0xff]  ;;  %v865_v34 = vld [vmem:[%s3038_s11 + $0x178] sm:$0xff] }
 0x2cc   :  { %v625_v20 = vpop.f32.mrb[4].mxu0 }
 0x2cd   :  { %v626_v21 = vadd.f32 %v1281_v19, %v625_v20  ;;  %v1553_v22 = vpop.f32.mrb[5].mxu0  ;;  %v1890_v20 = vpack.c.bf16 %v842_v15, %v835_v14  ;;  %v844_v14 = vld [vmem:[%s3038_s11 + $0xd0] sm:$0xff] }
 0x2ce   :  { %v841_v22 = vld [vmem:[%s3038_s11 + $0xb8] sm:$0xff] }
 0x2cf   :  { %v629_v23 = vmax.f32 %v626_v21, 0.0  ;;  %v834_v21 = vld [vmem:[%s3038_s11 + $0x80] sm:$0xff] }
 0x2d0   :  { %v1892_v25 = vpack.c.bf16 %v841_v22, %v834_v21  ;;  %v843_v22 = vld [vmem:[%s3038_s11 + $0xc8] sm:$0xff] }
 0x2d1   :  { %1587 = vmatmul.mubr.f32.vlgmr.msra.gmra.mrb[6].mxu1 %v629_v23  ;;  %v849_v23 = vld [vmem:[%s3038_s11 + $0xf8] sm:$0xff] }
 0x2d2   :  { %1031 = vmatprep.mubr.f32.mxu1 %v2018_v60  ;;  %1857 = vmatpush1.bf16.msra.mxu1 %v1856_v35  ;;  %v1894_v26 = vpack.c.bf16 %v856_v24, %v849_v23  ;;  %v877_v35 = vld [vmem:[%s3038_s11 + $0x1d8] sm:$0xff]  ;;  %v838_v23 = vld [vmem:[%s3038_s11 + $0xa0] sm:$0xff] }
 0x2d3   :  { %1859 = vmatprep.subr.bf16.mxu1 %v1858_v38  ;;  %v1902_v38 = vpack.c.bf16 %v884_v36, %v877_v35  ;;  %v845_v24 = vld [vmem:[%s3038_s11 + $0xd8] sm:$0xff]  ;;  %v872_v35 = vld [vmem:[%s3038_s11 + $0x1b0] sm:$0xff] }
 0x2d4   :  { %v1954_v28 = vpack.c.bf16 %v845_v24, %v838_v23  ;;  %v1930_v39 = vpack.c.bf16 %v872_v35, %v865_v34  ;;  %v930_v23 = vld [vmem:[%s3039_s12] sm:$0x7f] }
 0x2d6   :  { %1861 = vmatpush1.bf16.msra.mxu1 %v1860_v41  ;;  %v891_v41 = vld [vmem:[%s3038_s11 + $0x248] sm:$0xff] }
 0x2d7   :  { %1863 = vmatprep.subr.bf16.mxu1 %v1862_v44  ;;  %v1906_v44 = vpack.c.bf16 %v898_v42, %v891_v41  ;;  %v873_v41 = vld [vmem:[%s3038_s11 + $0x1b8] sm:$0xff]  ;;  %v879_v42 = vld [vmem:[%s3038_s11 + $0x1e8] sm:$0xff] }
 0x2da   :  { %1865 = vmatpush1.bf16.msra.mxu1 %v1864_v47  ;;  %v905_v47 = vld [vmem:[%s3038_s11 + $0x2b8] sm:$0xff] }
 0x2db   :  { %1867 = vmatprep.subr.bf16.mxu1 %v1866_v51  ;;  %v1910_v51 = vpack.c.bf16 %v912_v48, %v905_v47  ;;  %v885_v48 = vld [vmem:[%s3038_s11 + $0x218] sm:$0xff] }
 0x2de   :  { %1869 = vmatpush1.bf16.msra.mxu1 %v1868_v54  ;;  %v1912_v54 = vpack.c.bf16 %v911_v53, %v904_v52  ;;  %v893_v52 = vld [vmem:[%s3038_s11 + $0x258] sm:$0xff]  ;;  %v900_v53 = vld [vmem:[%s3038_s11 + $0x290] sm:$0xff] }
 0x2df   :  { %1871 = vmatprep.subr.bf16.mxu1 %v1870_v57  ;;  %v919_v57 = vld [vmem:[%s3038_s11 + $0x328] sm:$0xff] }
 0x2e0   :  { %v1914_v63 = vpack.c.bf16 %v926_v59, %v919_v57  ;;  %v1938_v57 = vpack.c.bf16 %v900_v53, %v893_v52  ;;  %v894_v59 = vld [vmem:[%s3038_s11 + $0x260] sm:$0xff] }
 0x2e2   :  { %1873 = vmatpush1.bf16.msra.mxu1 %v1872_v61  ;;  %v916_v61 = vld [vmem:[%s3038_s11 + $0x310] sm:$0xff] }
 0x2e3   :  { %1875 = vmatprep.subr.bf16.mxu1 %v1874_v0  ;;  %v1884_v0 = vpack.c.bf16 %v923_v62, %v916_v61  ;;  %v901_v61 = vld [vmem:[%s3038_s11 + $0x298] sm:$0xff]  ;;  %v907_v62 = vld [vmem:[%s3038_s11 + $0x2c8] sm:$0xff] }
 0x2e6   :  { %1877 = vmatpush1.bf16.msra.mxu1 %v1876_v3  ;;  %v1916_v3 = vpack.c.bf16 %v925_v2, %v918_v1  ;;  %v1966_v1 = vpack.c.bf16 %v901_v61, %v894_v59  ;;  %v906_v2 = vld [vmem:[%s3038_s11 + $0x2c0] sm:$0xff] }
 0x2e7   :  { %1879 = vmatprep.subr.bf16.mxu1 %v1878_v6  ;;  %v1918_v6 = vpack.c.bf16 %v830_v5, %v823_v4  ;;  %v913_v4 = vld [vmem:[%s3038_s11 + $0x2f8] sm:$0xff]  ;;  %v908_v5 = vld [vmem:[%s3038_s11 + $0x2d0] sm:$0xff] }
 0x2ea   :  { %1881 = vmatpush1.bf16.msra.mxu1 %v1880_v9  ;;  %v829_v9 = vld [vmem:[%s3038_s11 + $0x58] sm:$0xff] }
 0x2eb   :  { %1883 = vmatprep.subr.bf16.mxu1 %v1882_v58  ;;  %v899_v58 = vld [vmem:[%s3038_s11 + $0x288] sm:$0xff] }
 0x2ee   :  { %1885 = vmatpush1.bf16.msra.mxu1 %v1884_v0  ;;  %v1940_v0 = vpack.c.bf16 %v899_v58, %v892_v56 }
 0x2ef   :  { %1919 = vmatprep.subr.bf16.mxu1 %v1918_v6  ;;  %v915_v6 = vld [vmem:[%s3038_s11 + $0x308] sm:$0xff] }
 0x3a4   :  { %v719_v13 = vpop.f32.mrb[6].mxu1 }
 0x3a5   :  { %v720_v16 = vadd.f32 %v1282_v10, %v719_v13  ;;  %v1588_v17 = vpop.f32.mrb[7].mxu1  ;;  %v824_v10 = vld [vmem:[%s3038_s11 + $0x30] sm:$0xff]  ;;  %v837_v13 = vld [vmem:[%s3038_s11 + $0x98] sm:$0xff] }
 0x3a6   :  { %v1920_v17 = vpack.c.bf16 %v829_v9, %v822_v8  ;;  %v1922_v21 = vpack.c.bf16 %v844_v14, %v837_v13  ;;  %v928_v8 = vld [vmem:[%s3038_s11 + $0x370] sm:$0xff]  ;;  %v1944_v9 = vpack.c.bf16 %v913_v4, %v906_v2  ;;  %v927_v13 = vld [vmem:[%s3038_s11 + $0x368] sm:$0xff]  ;;  %v922_v14 = vld [vmem:[%s3038_s11 + $0x340] sm:$0xff] }
 0x3a7   :  { %v723_v19 = vmax.f32 %v720_v16, 0.0 }
 0x3a9   :  { %1622 = vmatmul.mubr.f32.vlgmr.msra.gmra.mrb[6].mxu0 %v723_v19  ;;  %v836_v19 = vld [vmem:[%s3038_s11 + $0x90] sm:$0xff] }
 0x3aa   :  { %1889 = vmatpush1.bf16.msra.mxu0 %v1888_v18  ;;  %1102 = vmatprep.mubr.f32.mxu0 %v2018_v60  ;;  %v1951_v18 = vpack.c.bf16 %v831_v11, %v824_v10  ;;  %v1924_v27 = vpack.c.bf16 %v843_v22, %v836_v19  ;;  %v1969_v10 = vpack.c.bf16 %v915_v6, %v908_v5  ;;  %v920_v11 = vld [vmem:[%s3038_s11 + $0x330] sm:$0xff] }
 0x3ab   :  { %1891 = vmatprep.subr.bf16.mxu0 %v1890_v20 }
 0x3ae   :  { %1893 = vmatpush1.bf16.msra.mxu0 %v1892_v25  ;;  %v851_v25 = vld [vmem:[%s3038_s11 + $0x108] sm:$0xff] }
 0x3af   :  { %1895 = vmatprep.subr.bf16.mxu0 %v1894_v26  ;;  %v858_v26 = vld [vmem:[%s3038_s11 + $0x140] sm:$0xff] }
 0x3b0   :  { %v1926_v30 = vpack.c.bf16 %v858_v26, %v851_v25 }
 0x3b2   :  { %1897 = vmatpush1.bf16.msra.mxu0 %v1896_v31  ;;  %v857_v31 = vld [vmem:[%s3038_s11 + $0x138] sm:$0xff] }
 0x3b3   :  { %1899 = vmatprep.subr.bf16.mxu0 %v1898_v32  ;;  %v852_v32 = vld [vmem:[%s3038_s11 + $0x110] sm:$0xff]  ;;  %v1928_v36 = vpack.c.bf16 %v857_v31, %v850_v29 }
 0x3b6   :  { %1901 = vmatpush1.bf16.msra.mxu0 %v1900_v37  ;;  %v1957_v37 = vpack.c.bf16 %v859_v33, %v852_v32 }
 0x3b7   :  { %1903 = vmatprep.subr.bf16.mxu0 %v1902_v38  ;;  %v864_v38 = vld [vmem:[%s3038_s11 + $0x170] sm:$0xff] }
 0x3ba   :  { %1905 = vmatpush1.bf16.msra.mxu0 %v1904_v43  ;;  %v886_v43 = vld [vmem:[%s3038_s11 + $0x220] sm:$0xff] }
 0x3bb   :  { %1907 = vmatprep.subr.bf16.mxu0 %v1906_v44  ;;  %v1932_v44 = vpack.c.bf16 %v871_v40, %v864_v38  ;;  %v1934_v47 = vpack.c.bf16 %v886_v43, %v879_v42 }
 0x3be   :  { %1909 = vmatpush1.bf16.msra.mxu0 %v1908_v49  ;;  %v880_v49 = vld [vmem:[%s3038_s11 + $0x1f0] sm:$0xff] }
 0x3bf   :  { %1911 = vmatprep.subr.bf16.mxu0 %v1910_v51  ;;  %v887_v51 = vld [vmem:[%s3038_s11 + $0x228] sm:$0xff] }
 0x3c0   :  { %v1963_v55 = vpack.c.bf16 %v887_v51, %v880_v49 }
 0x3c2   :  { %1913 = vmatpush1.bf16.msra.mxu0 %v1912_v54  ;;  %v1936_v54 = vpack.c.bf16 %v885_v48, %v878_v46 }
 0x3c3   :  { %1915 = vmatprep.subr.bf16.mxu0 %v1914_v63  ;;  %v914_v63 = vld [vmem:[%s3038_s11 + $0x300] sm:$0xff] }
 0x3c6   :  { %1917 = vmatpush1.bf16.msra.mxu0 %v1916_v3  ;;  %v1942_v3 = vpack.c.bf16 %v914_v63, %v907_v62 }
 0x3c7   :  { %1950 = vmatprep.subr.bf16.mxu0 %v2016_v50 }
 0x47c   :  { %v813_v12 = vpop.f32.mrb[6].mxu0 }
 0x47d   :  { %v814_v15 = vadd.f32 %v1283_v7, %v813_v12  ;;  %v1623_v16 = vpop.f32.mrb[7].mxu0  ;;  %v921_v7 = vld [vmem:[%s3038_s11 + $0x338] sm:$0xff] }
 0x47e   :  { %v1946_v12 = vpack.c.bf16 %v928_v8, %v921_v7  ;;  %v1948_v16 = vpack.c.bf16 %v927_v13, %v920_v11 }
 0x47f   :  { %v2878_v20 = vmax.f32 %v814_v15, 0.0  ;;  %v929_v15 = vld [vmem:[%s3038_s11 + $0x378] sm:$0xff] }
 0x481   :  { %1032 = vmatmul.mubr.f32.vlgmr.msra.gmra.mrb[8].mxu1 %v2878_v20  ;;  %1103 = vmatmul.mubr.f32.vlgmr.msra.gmra.mrb[8].mxu0 %v2878_v20 }
 0x482   :  { %1921 = vmatpush1.bf16.msra.mxu1 %v1920_v17  ;;  %1952 = vmatpush3.bf16.msra.mxu0 %v1951_v18  ;;  %v1972_v17 = vpack.c.bf16 %v929_v15, %v922_v14  ;;  %v932_v18 = vlaneseq }
 0x483   :  { %1923 = vmatprep.subr.bf16.mxu1 %v1922_v21  ;;  %1953 = vmatprep.subr.bf16.mxu0 %v2016_v50 }
 0x484   :  { %1173 = vmatprep.mubr.f32.mxu1 %v2018_v60  ;;  %1656 = vmatprep.mubr.msk.f32.mxu0 %vm2017_vm0, %v2018_v60  ;;  %v866_v60 = vld [vmem:[%s3038_s11 + $0x180] sm:$0xff]  ;;  %v933_v19 = vshrl.u32 %v932_v18, 7  ;;  %s2019_s11 = smov [#allocation2]  }
 0x485   :  { %v1960_v45 = vpack.c.bf16 %v873_v41, %v866_v60  ;;  %s1270_s12 = sshll.u32 %s2019_s11, 4  ;;  %s1271_s12 = int_to_ptr.vmem [resolvable:$true] %s1270_s12 }
 0x486   :  { %1925 = vmatpush1.bf16.msra.mxu1 %v1924_v27  ;;  %1955 = vmatpush3.bf16.msra.mxu0 %v1954_v28  ;;  %v934_v21 = vsub.s32 0, %v933_v19  ;;  %v942_v22 = vsub.s32 2, %v933_v19  ;;  %v938_v24 = vsub.s32 1, %v933_v19  ;;  %v946_v25 = vsub.s32 3, %v933_v19  ;;  %s1992_s10 = scalar_lea.vmem %s1271_s12, 896  ;;  %p1997_p1 = scmp.lt.s32.totalorder %s1271_s12, %s1271_s12 }
 0x487   :  { %1927 = vmatprep.subr.bf16.mxu1 %v1926_v30  ;;  %1956 = vmatprep.subr.bf16.mxu0 %v2016_v50  ;;  %v950_v40 = vsub.s32 4, %v933_v19  ;;  %v958_v60 = vsub.s32 6, %v933_v19  ;;  %v954_v41 = vsub.s32 5, %v933_v19  ;;  %p1993_p0 = scmp.ne.s32.totalorder %s1271_s12, %s1992_s10  ;;  %p1998_p2 = scmp.lt.s32.totalorder %s1992_s10, %s1992_s10 }
 0x488   :  { %v935_v26 = vrot.slane %v930_v23, %v934_v21  ;;  %v943_v27 = vrot.slane %v930_v23, %v942_v22  ;;  %v939_v28 = vrot.slane %v930_v23, %v938_v24 }
 0x489   :  { %v951_v42 = vrot.slane %v930_v23, %v950_v40  ;;  %v959_v43 = vrot.slane %v930_v23, %v958_v60  ;;  %p1999_p3 = por %p1998_p2, %p1997_p1 }
 0x48a   :  { %1929 = vmatpush1.bf16.msra.mxu1 %v1928_v36  ;;  %1958 = vmatpush3.bf16.msra.mxu0 %v1957_v37 }
 0x48b   :  { %1931 = vmatprep.subr.bf16.mxu1 %v1930_v39  ;;  %1959 = vmatprep.subr.bf16.mxu0 %v2016_v50  ;;  %p2000_p4 = pnand %p1999_p3, %p1993_p0 }
 0x48e   :  { %1933 = vmatpush1.bf16.msra.mxu1 %v1932_v44  ;;  %1961 = vmatpush3.bf16.msra.mxu0 %v1960_v45  ;;  %v955_v44 = vrot.slane %v930_v23, %v954_v41 }
 0x48f   :  { %1935 = vmatprep.subr.bf16.mxu1 %v1934_v47  ;;  %1962 = vmatprep.subr.bf16.mxu0 %v2016_v50 }
 0x492   :  { %1937 = vmatpush1.bf16.msra.mxu1 %v1936_v54  ;;  %1964 = vmatpush3.bf16.msra.mxu0 %v1963_v55 }
 0x493   :  { %1939 = vmatprep.subr.bf16.mxu1 %v1938_v57  ;;  %1965 = vmatprep.subr.bf16.mxu0 %v2016_v50 }
 0x496   :  { %1941 = vmatpush1.bf16.msra.mxu1 %v1940_v0  ;;  %1967 = vmatpush3.bf16.msra.mxu0 %v1966_v1 }
 0x497   :  { %1943 = vmatprep.subr.bf16.mxu1 %v1942_v3  ;;  %1968 = vmatprep.subr.bf16.mxu0 %v2016_v50 }
 0x49a   :  { %1945 = vmatpush1.bf16.msra.mxu1 %v1944_v9  ;;  %1970 = vmatpush3.bf16.msra.mxu0 %v1969_v10 }
 0x49b   :  { %1947 = vmatprep.subr.bf16.mxu1 %v1946_v12  ;;  %1971 = vmatprep.subr.bf16.mxu0 %v2016_v50  ;;  %v947_v50 = vrot.slane %v930_v23, %v946_v25 }
 0x49e   :  { %1949 = vmatpush1.bf16.msra.mxu1 %v1948_v16  ;;  %1973 = vmatpush3.bf16.msra.mxu0 %v1972_v17 }
 0x4a1   :  { %1174 = vmatmul.mubr.f32.vlgmr.msra.gmra.mrb[10].mxu1 %v2878_v20  ;;  %1657 = vmatmul.mubr.f32.vlgmr.msra.gmra.mrb[10].mxu0 %v2878_v20 }
 0x554   :  { %v1033_v29 = vpop.f32.mrb[8].mxu1  ;;  %v1104_v30 = vpop.f32.mrb[8].mxu0 }
 0x555   :  { %v1034_v31 = vadd.f32 %v1033_v29, %v935_v26  ;;  %v1105_v32 = vadd.f32 %v1104_v30, %v943_v27  ;;  %v1035_v33 = vpop.f32.mrb[9].mxu1  ;;  %v1106_v20 = vpop.f32.mrb[9].mxu0 }
 0x556   :  { %v1036_v34 = vadd.f32 %v1035_v33, %v939_v28  ;;  %v1107_v35 = vadd.f32 %v1106_v20, %v947_v50 }
 0x557   :  { %1978 = vtanh.f32 %v1034_v31 }
 0x558   :  { %1980 = vtanh.f32 %v1105_v32 }
 0x559   :  { %1982 = vtanh.f32 %v1036_v34 }
 0x55a   :  { %1984 = vtanh.f32 %v1107_v35 }
 0x561   :  { %v1979_v36 = vpop.eup %1978 }
 0x562   :  { %v1981_v37 = vpop.eup %1980  ;;  %1257 = vst [vmem:[#allocation2] sm:$0xff] %v1979_v36 }
 0x563   :  { %v1983_v38 = vpop.eup %1982  ;;  %1259 = vst [vmem:[#allocation2 + $0x10] sm:$0xff] %v1981_v37 }
 0x564   :  { %v1985_v39 = vpop.eup %1984  ;;  %1258 = vst [vmem:[#allocation2 + $0x8] sm:$0xff] %v1983_v38 }
 0x565   :  { %1260 = vst [vmem:[#allocation2 + $0x18] sm:$0xff] %v1985_v39 }
 0x574   :  { %v1175_v45 = vpop.f32.mrb[10].mxu1  ;;  %v1246_v46 = vpop.f32.mrb[10].mxu0 }
 0x575   :  { %v1176_v47 = vadd.f32 %v1175_v45, %v951_v42  ;;  %v1247_v48 = vadd.f32 %v1246_v46, %v959_v43  ;;  %v1177_v49 = vpop.f32.mrb[11].mxu1  ;;  %v1658_v51 = vpop.f32.mrb[11].mxu0 }
 0x576   :  { %v1178_v52 = vadd.f32 %v1177_v49, %v955_v44 }
 0x577   :  { %1986 = vtanh.f32 %v1176_v47 }
 0x578   :  { %1988 = vtanh.f32 %v1247_v48 }
 0x579   :  { %1990 = vtanh.f32 %v1178_v52 }
 0x581   :  { %v1987_v53 = vpop.eup %1986 }
 0x582   :  { %v1989_v54 = vpop.eup %1988  ;;  %1261 = vst [vmem:[#allocation2 + $0x20] sm:$0xff] %v1987_v53 }
 0x583   :  { %v1991_v55 = vpop.eup %1990  ;;  %1263 = vst.msk [vmem:[#allocation2 + $0x30] sm:$0xff] %vm157_vm1, %v1989_v54 }
 0x584   :  { %1262 = vst [vmem:[#allocation2 + $0x28] sm:$0xff] %v1991_v55 }
 0x585   :  { %2003 = shalt.err (!%p2000_p4)
}
 0x586   :  { %s2004_s28 = scalar_lea.hbm %s3040_s13, 896 }
 0x587   :  { %p2005_p5 = scmp.ne.s32.totalorder %s3040_s13, %s2004_s28  ;;  %p2008_p6 = scmp.lt.u32.totalorder %s2004_s28, %s3040_s13 }
 0x589   :  { %p2010_p7 = pnand %p2008_p6, %p2005_p5 }
 0x58b   :  { %2013 = shalt.err (!%p2010_p7)
}
 0x58c   :  { %1273 = dma.vmem_to_hbm [thread:$0]  %s1271_s12, 896, %s3040_s13, [#allocation3]  }
 0x58d   :  { %2014 = dma.done.wait [#allocation3], 896  }
 0x58e   :  { %2015 = vsyncadd [#allocation3], 4294966400 }
 0x58f   :  { %1277 = vsyncpa [#allocation3], 1 }

</bundles_post_ra>
